<compile_context>
chip_gen: v6e
topology: v6e:2x2x1
jax: 0.10.0
libtpu: 0.0.40
codegen_flags: <defaults>
</compile_context>

<pallas_src>
import jax
import jax.numpy as jnp
from jax.experimental import pallas as pl
from jax.experimental.pallas import tpu as pltpu

BN_EPS = 1e-5
K_PAD = 1024  # fc_mask contraction dim padded 1000 -> 1024


def _bn_batch_stats(h, gamma, beta):
    """BatchNorm1d with track_running_stats=False: batch mean / biased batch variance
    (PyTorch semantics), then affine.  d = h - mean is hoisted and reused."""
    mean = jnp.mean(h, axis=0, keepdims=True)
    d = h - mean
    var = jnp.mean(d * d, axis=0, keepdims=True)
    return d * jax.lax.rsqrt(var + BN_EPS) * gamma + beta


def _attr_classifier_kernel(
    x_ref,       # (B, 1024) f32   clothed_body_features zero-padded in K
    hp_ref,      # (B, 2)    f32   human_param
    w_mask_ref,  # (1024, 256) bf16  fc_mask weight, rows 1000:1024 zero
    w_pack_ref,  # (256, 384) bf16   lanes 0:128 w_t1, 128:256 w_a1_feat,
                 #                   256:384 fused out-weight (rows 0:128 w_t2 pad, 128:256 w_a2 pad)
    pk_ref,      # (8, 256)  f32    rows: 0 g_mask, 1 be_mask, 2 g_t1, 3 be_t1, 4 b_a1,
                 #                  5 w_a1_hp[0], 6 w_a1_hp[1], 7 b_out  (rows 2..7 use lanes 0:128)
    out_ref,     # (B, 128)  f32    cols [0:n_class] = cloth_type, [n_class:n_class+3] = cloth_att
):
    pk = pk_ref[...]   # single whole-block load; slice the loaded value, not the ref
    hp = hp_ref[...]

    # ---- fc_mask: Linear(1000->256) -> BN(256) -> Dropout(identity) -> ReLU
    # (bias dropped: cancelled by BN mean subtraction; bf16 x bf16 MXU, f32 accumulate)
    h = jnp.dot(x_ref[...].astype(jnp.bfloat16), w_mask_ref[...],
                preferred_element_type=jnp.float32)                       # (B, 256)
    features = jnp.maximum(_bn_batch_stats(h, pk[0:1, :], pk[1:2, :]), 0.0)
    f16 = features.astype(jnp.bfloat16)

    # ---- fc_type1: Linear(256->128) -> BN(128) -> Dropout(identity) -> ReLU  (bias dropped)
    t = jnp.dot(f16, w_pack_ref[:, 0:128], preferred_element_type=jnp.float32)
    t = jnp.maximum(_bn_batch_stats(t, pk[2:3, 0:128], pk[3:4, 0:128]), 0.0)  # (B, 128)

    # ---- fc_att1: Linear(258->128) on cat(features, human_param) -> ReLU
    # cat(f, hp) @ W = f @ W[:256] + hp @ W[256:]; the K=2 part runs as f32 VPU broadcast FMAs.
    a = jnp.dot(f16, w_pack_ref[:, 128:256], preferred_element_type=jnp.float32)
    a = a + hp[:, 0:1] * pk[5:6, 0:128] + hp[:, 1:2] * pk[6:7, 0:128] + pk[4:5, 0:128]
    a = jnp.maximum(a, 0.0)                                                # (B, 128)

    # ---- fc_type2 / fc_att2 fused into ONE MXU call + one lane-dense store:
    # [t | a] (B,256) @ w_pack[:,256:384] (256,128), biases pre-packed in pk row 7.
    ta = jnp.concatenate([t, a], axis=-1).astype(jnp.bfloat16)             # (B, 256)
    out_ref[...] = (
        jnp.dot(ta, w_pack_ref[:, 256:384], preferred_element_type=jnp.float32)
        + pk[7:8, 0:128]
    )


def pack_params(p, n_class):
    """Pack logical (f32) parameters into the 3 kernel parameter arrays."""
    assert n_class + 3 <= 128, "packed (B,128) output requires n_class + 3 <= 128"

    # fc_mask weight: bf16, K padded 1000 -> 1024 with zero rows (pad is correctness-neutral).
    w_mask = (jnp.zeros((K_PAD, 256), jnp.bfloat16)
              .at[:1000, :].set(p["w_mask"].astype(jnp.bfloat16)))

    # Fused output weight (256,128): rows 0:128 = w_t2 in cols [0:n_class],
    # rows 128:256 = w_a2 in cols [n_class:n_class+3].
    w_t2_pad = jnp.zeros((128, 128), jnp.float32).at[:, :n_class].set(p["w_t2"])
    w_a2_pad = jnp.zeros((128, 128), jnp.float32).at[:, n_class:n_class + 3].set(p["w_a2"])
    w_out = jnp.concatenate([w_t2_pad, w_a2_pad], axis=0)                  # (256, 128)

    # One (256, 384) bf16 weight pack: w_t1 | w_a1_feat | w_out along lanes.
    w_pack = jnp.concatenate([p["w_t1"], p["w_a1_feat"], w_out], axis=1).astype(jnp.bfloat16)

    b_out = (jnp.zeros((1, 128), jnp.float32)
             .at[:, :n_class].set(p["b_t2"][0])
             .at[:, n_class:n_class + 3].set(p["b_a2"][0]))

    def pad_to_256(v):  # (1,128) -> (1,256), payload in lanes 0:128
        return jnp.pad(v, ((0, 0), (0, 128)))

    pk = jnp.concatenate(
        [p["g_mask"], p["be_mask"],
         pad_to_256(p["g_t1"]), pad_to_256(p["be_t1"]), pad_to_256(p["b_a1"]),
         pad_to_256(p["w_a1_hp"][0:1]), pad_to_256(p["w_a1_hp"][1:2]),
         pad_to_256(b_out)],
        axis=0,
    )  # (8, 256) f32

    return dict(w_mask=w_mask, w_pack=w_pack, pk=pk)


def attribute_classifier_forward(x, human_param, packed, n_class):
    """Run the fused forward kernel. All operands live fully in VMEM (~0.7 MiB total)."""
    B, K = x.shape
    x_pad = jnp.pad(x, ((0, 0), (0, K_PAD - K)))  # zero cols; w_mask pad rows are zero anyway

    inputs = (x_pad, human_param, packed["w_mask"], packed["w_pack"], packed["pk"])

    flops = 2 * B * (K_PAD * 256 + 256 * 128 + 256 * 128 + 256 * 128)
    bytes_accessed = (
        B * K_PAD * 4 + B * 2 * 4
        + packed["w_mask"].size * 2 + packed["w_pack"].size * 2 + packed["pk"].size * 4
        + B * 128 * 4
    )

    vmem = pl.BlockSpec(memory_space=pltpu.MemorySpace.VMEM)
    out = pl.pallas_call(
        _attr_classifier_kernel,
        out_shape=jax.ShapeDtypeStruct((B, 128), jnp.float32),
        in_specs=[vmem] * len(inputs),
        out_specs=vmem,
        cost_estimate=pl.CostEstimate(
            flops=flops, transcendentals=384, bytes_accessed=bytes_accessed),
    )(*inputs)

    cloth_type = out[:, :n_class]
    cloth_att = out[:, n_class:n_class + 3]
    return cloth_type, cloth_att


def init_params(key, n_class=4):
    """Deterministic synthetic parameters (PyTorch-default-like uniform init), all f32.
    Weights stored as (in_features, out_features); pack_params handles bf16 casts/padding."""
    def linear(key, fan_in, fan_out):
        kw, kb = jax.random.split(key)
        bound = 1.0 / (fan_in ** 0.5)
        w = jax.random.uniform(kw, (fan_in, fan_out), jnp.float32, -bound, bound)
        b = jax.random.uniform(kb, (1, fan_out), jnp.float32, -bound, bound)
        return w, b

    keys = jax.random.split(key, 8)
    w_mask, b_mask = linear(keys[0], 1000, 256)
    w_t1, b_t1 = linear(keys[1], 256, 128)
    w_t2, b_t2 = linear(keys[2], 128, n_class)
    w_a1, b_a1 = linear(keys[3], 258, 128)
    w_a2, b_a2 = linear(keys[4], 128, 3)
    return dict(
        w_mask=w_mask,
        b_mask=b_mask,                       # kept only for the reference (cancelled by BN)
        g_mask=jnp.ones((1, 256), jnp.float32), be_mask=jnp.zeros((1, 256), jnp.float32),
        w_t1=w_t1, b_t1=b_t1,                # b_t1 likewise cancelled by BN
        g_t1=jnp.ones((1, 128), jnp.float32), be_t1=jnp.zeros((1, 128), jnp.float32),
        w_t2=w_t2, b_t2=b_t2,
        w_a1_feat=w_a1[:256, :], w_a1_hp=w_a1[256:, :], b_a1=b_a1,
        w_a2=w_a2, b_a2=b_a2,
    )


def reference_forward(x, hp, p):
    """Pure-JAX f32 reference matching PyTorch eval-mode forward (BN uses batch stats).
    Keeps the pre-BN biases to demonstrate they are cancelled."""
    def bn(h, g, b):
        m = jnp.mean(h, axis=0, keepdims=True)
        v = jnp.mean((h - m) ** 2, axis=0, keepdims=True)
        return (h - m) / jnp.sqrt(v + BN_EPS) * g + b

    features = jnp.maximum(bn(x @ p["w_mask"] + p["b_mask"], p["g_mask"], p["be_mask"]), 0.0)
    t = jnp.maximum(bn(features @ p["w_t1"] + p["b_t1"], p["g_t1"], p["be_t1"]), 0.0)
    cloth_type = t @ p["w_t2"] + p["b_t2"]
    concat = jnp.concatenate([features, hp], axis=-1)
    w_a1 = jnp.concatenate([p["w_a1_feat"], p["w_a1_hp"]], axis=0)
    a = jnp.maximum(concat @ w_a1 + p["b_a1"], 0.0)
    cloth_att = a @ p["w_a2"] + p["b_a2"]
    return cloth_type, cloth_att


if __name__ == "__main__":
    key = jax.random.PRNGKey(0)
    k_params, k_x, k_hp = jax.random.split(key, 3)

    B, n_class = 8, 4   # BN batch stats require B >= 2
    params = init_params(k_params, n_class=n_class)
    packed = pack_params(params, n_class)

    x = jax.random.normal(k_x, (B, 1000), jnp.float32)        # clothed_body_features
    human_param = jax.random.normal(k_hp, (B, 2), jnp.float32)

    cloth_type, cloth_att = attribute_classifier_forward(x, human_param, packed, n_class)
    cloth_type = jax.block_until_ready(cloth_type)
    cloth_att = jax.block_until_ready(cloth_att)

    ref_type, ref_att = reference_forward(x, human_param, params)
    assert cloth_type.shape == (B, n_class) and cloth_att.shape == (B, 3)
    # bf16 weights + bf16 MXU activations end-to-end -> ~1e-2 relative error vs the f32 reference.
    assert jnp.allclose(cloth_type, ref_type, atol=3e-2, rtol=3e-2)
    assert jnp.allclose(cloth_att, ref_att, atol=3e-2, rtol=3e-2)

    print("KERNEL_OK")
</pallas_src>

<mosaic_0001>
module attributes {stable_mosaic.version = 11 : i64} {
  func.func @_attr_classifier_kernel(%arg0: memref<8x1024xf32, #tpu.memory_space<vmem>>, %arg1: memref<8x2xf32, #tpu.memory_space<vmem>>, %arg2: memref<1024x256xbf16, #tpu.memory_space<vmem>>, %arg3: memref<256x384xbf16, #tpu.memory_space<vmem>>, %arg4: memref<8x256xf32, #tpu.memory_space<vmem>>, %arg5: memref<8x128xf32, #tpu.memory_space<vmem>>) attributes {dimension_semantics = [], scalar_prefetch = 0 : i64, scratch_operands = 0 : i64, tpu.core_type = #tpu.core_type<tc>} {
    %c0 = arith.constant 0 : index
    %c0_0 = arith.constant 0 : index
    %0 = vector.load %arg4[%c0, %c0_0] : memref<8x256xf32, #tpu.memory_space<vmem>>, vector<8x256xf32>
    %c0_1 = arith.constant 0 : index
    %c0_2 = arith.constant 0 : index
    %1 = vector.load %arg1[%c0_1, %c0_2] : memref<8x2xf32, #tpu.memory_space<vmem>>, vector<8x2xf32>
    %c0_3 = arith.constant 0 : index
    %c0_4 = arith.constant 0 : index
    %2 = vector.load %arg0[%c0_3, %c0_4] : memref<8x1024xf32, #tpu.memory_space<vmem>>, vector<8x1024xf32>
    %3 = arith.truncf %2 : vector<8x1024xf32> to vector<8x1024xbf16>
    %c0_5 = arith.constant 0 : index
    %c0_6 = arith.constant 0 : index
    %4 = vector.load %arg2[%c0_5, %c0_6] : memref<1024x256xbf16, #tpu.memory_space<vmem>>, vector<1024x256xbf16>
    %cst = arith.constant dense<0.000000e+00> : vector<8x256xf32>
    %5 = tpu.matmul %3, %4, %cst {dimension_numbers = #tpu.dot_dimension_numbers<[1], [0], [0], [1], [0, 0, 1, 1], [], []>} : vector<8x1024xbf16>, vector<1024x256xbf16>, vector<8x256xf32> -> vector<8x256xf32>
    %6 = vector.extract_strided_slice %0 {offsets = [0, 0], sizes = [1, 256], strides = [1, 1]} : vector<8x256xf32> to vector<1x256xf32>
    %7 = vector.extract_strided_slice %0 {offsets = [1, 0], sizes = [1, 256], strides = [1, 1]} : vector<8x256xf32> to vector<1x256xf32>
    %cst_7 = arith.constant dense<0.000000e+00> : vector<256xf32>
    %8 = vector.multi_reduction <add>, %5, %cst_7 [0] : vector<8x256xf32> to vector<256xf32>
    %9 = vector.shape_cast %8 : vector<256xf32> to vector<1x256xf32>
    %cst_8 = arith.constant 8.000000e+00 : f32
    %10 = vector.broadcast %cst_8 : f32 to vector<1x256xf32>
    %11 = arith.divf %9, %10 : vector<1x256xf32>
    %12 = vector.broadcast %11 : vector<1x256xf32> to vector<8x256xf32>
    %13 = arith.subf %5, %12 : vector<8x256xf32>
    %14 = arith.mulf %13, %13 : vector<8x256xf32>
    %cst_9 = arith.constant dense<0.000000e+00> : vector<256xf32>
    %15 = vector.multi_reduction <add>, %14, %cst_9 [0] : vector<8x256xf32> to vector<256xf32>
    %16 = vector.shape_cast %15 : vector<256xf32> to vector<1x256xf32>
    %cst_10 = arith.constant 8.000000e+00 : f32
    %17 = vector.broadcast %cst_10 : f32 to vector<1x256xf32>
    %18 = arith.divf %16, %17 : vector<1x256xf32>
    %cst_11 = arith.constant 9.99999974E-6 : f32
    %19 = vector.broadcast %cst_11 : f32 to vector<1x256xf32>
    %20 = arith.addf %18, %19 : vector<1x256xf32>
    %21 = math.rsqrt %20 : vector<1x256xf32>
    %22 = vector.broadcast %21 : vector<1x256xf32> to vector<8x256xf32>
    %23 = arith.mulf %13, %22 : vector<8x256xf32>
    %24 = vector.broadcast %6 : vector<1x256xf32> to vector<8x256xf32>
    %25 = arith.mulf %23, %24 : vector<8x256xf32>
    %26 = vector.broadcast %7 : vector<1x256xf32> to vector<8x256xf32>
    %27 = arith.addf %25, %26 : vector<8x256xf32>
    %cst_12 = arith.constant 0.000000e+00 : f32
    %28 = vector.broadcast %cst_12 : f32 to vector<8x256xf32>
    %29 = arith.maximumf %27, %28 : vector<8x256xf32>
    %30 = arith.truncf %29 : vector<8x256xf32> to vector<8x256xbf16>
    %c0_13 = arith.constant 0 : index
    %c0_14 = arith.constant 0 : index
    %31 = vector.load %arg3[%c0_13, %c0_14] : memref<256x384xbf16, #tpu.memory_space<vmem>>, vector<256x128xbf16>
    %cst_15 = arith.constant dense<0.000000e+00> : vector<8x128xf32>
    %32 = tpu.matmul %30, %31, %cst_15 {dimension_numbers = #tpu.dot_dimension_numbers<[1], [0], [0], [1], [0, 0, 1, 1], [], []>} : vector<8x256xbf16>, vector<256x128xbf16>, vector<8x128xf32> -> vector<8x128xf32>
    %33 = vector.extract_strided_slice %0 {offsets = [2, 0], sizes = [1, 128], strides = [1, 1]} : vector<8x256xf32> to vector<1x128xf32>
    %34 = vector.extract_strided_slice %0 {offsets = [3, 0], sizes = [1, 128], strides = [1, 1]} : vector<8x256xf32> to vector<1x128xf32>
    %cst_16 = arith.constant dense<0.000000e+00> : vector<128xf32>
    %35 = vector.multi_reduction <add>, %32, %cst_16 [0] : vector<8x128xf32> to vector<128xf32>
    %36 = vector.shape_cast %35 : vector<128xf32> to vector<1x128xf32>
    %cst_17 = arith.constant 8.000000e+00 : f32
    %37 = vector.broadcast %cst_17 : f32 to vector<1x128xf32>
    %38 = arith.divf %36, %37 : vector<1x128xf32>
    %39 = vector.broadcast %38 : vector<1x128xf32> to vector<8x128xf32>
    %40 = arith.subf %32, %39 : vector<8x128xf32>
    %41 = arith.mulf %40, %40 : vector<8x128xf32>
    %cst_18 = arith.constant dense<0.000000e+00> : vector<128xf32>
    %42 = vector.multi_reduction <add>, %41, %cst_18 [0] : vector<8x128xf32> to vector<128xf32>
    %43 = vector.shape_cast %42 : vector<128xf32> to vector<1x128xf32>
    %cst_19 = arith.constant 8.000000e+00 : f32
    %44 = vector.broadcast %cst_19 : f32 to vector<1x128xf32>
    %45 = arith.divf %43, %44 : vector<1x128xf32>
    %cst_20 = arith.constant 9.99999974E-6 : f32
    %46 = vector.broadcast %cst_20 : f32 to vector<1x128xf32>
    %47 = arith.addf %45, %46 : vector<1x128xf32>
    %48 = math.rsqrt %47 : vector<1x128xf32>
    %49 = vector.broadcast %48 : vector<1x128xf32> to vector<8x128xf32>
    %50 = arith.mulf %40, %49 : vector<8x128xf32>
    %51 = vector.broadcast %33 : vector<1x128xf32> to vector<8x128xf32>
    %52 = arith.mulf %50, %51 : vector<8x128xf32>
    %53 = vector.broadcast %34 : vector<1x128xf32> to vector<8x128xf32>
    %54 = arith.addf %52, %53 : vector<8x128xf32>
    %cst_21 = arith.constant 0.000000e+00 : f32
    %55 = vector.broadcast %cst_21 : f32 to vector<8x128xf32>
    %56 = arith.maximumf %54, %55 : vector<8x128xf32>
    %c0_22 = arith.constant 0 : index
    %c128 = arith.constant 128 : index
    %57 = vector.load %arg3[%c0_22, %c128] : memref<256x384xbf16, #tpu.memory_space<vmem>>, vector<256x128xbf16>
    %cst_23 = arith.constant dense<0.000000e+00> : vector<8x128xf32>
    %58 = tpu.matmul %30, %57, %cst_23 {dimension_numbers = #tpu.dot_dimension_numbers<[1], [0], [0], [1], [0, 0, 1, 1], [], []>} : vector<8x256xbf16>, vector<256x128xbf16>, vector<8x128xf32> -> vector<8x128xf32>
    %59 = vector.extract_strided_slice %1 {offsets = [0, 0], sizes = [8, 1], strides = [1, 1]} : vector<8x2xf32> to vector<8x1xf32>
    %60 = vector.extract_strided_slice %0 {offsets = [5, 0], sizes = [1, 128], strides = [1, 1]} : vector<8x256xf32> to vector<1x128xf32>
    %61 = vector.broadcast %59 : vector<8x1xf32> to vector<8x128xf32>
    %62 = vector.broadcast %60 : vector<1x128xf32> to vector<8x128xf32>
    %63 = arith.mulf %61, %62 : vector<8x128xf32>
    %64 = arith.addf %58, %63 : vector<8x128xf32>
    %65 = vector.extract_strided_slice %1 {offsets = [0, 1], sizes = [8, 1], strides = [1, 1]} : vector<8x2xf32> to vector<8x1xf32>
    %66 = vector.extract_strided_slice %0 {offsets = [6, 0], sizes = [1, 128], strides = [1, 1]} : vector<8x256xf32> to vector<1x128xf32>
    %67 = vector.broadcast %65 : vector<8x1xf32> to vector<8x128xf32>
    %68 = vector.broadcast %66 : vector<1x128xf32> to vector<8x128xf32>
    %69 = arith.mulf %67, %68 : vector<8x128xf32>
    %70 = arith.addf %64, %69 : vector<8x128xf32>
    %71 = vector.extract_strided_slice %0 {offsets = [4, 0], sizes = [1, 128], strides = [1, 1]} : vector<8x256xf32> to vector<1x128xf32>
    %72 = vector.broadcast %71 : vector<1x128xf32> to vector<8x128xf32>
    %73 = arith.addf %70, %72 : vector<8x128xf32>
    %cst_24 = arith.constant 0.000000e+00 : f32
    %74 = vector.broadcast %cst_24 : f32 to vector<8x128xf32>
    %75 = arith.maximumf %73, %74 : vector<8x128xf32>
    %76 = tpu.concatenate %56, %75 in 1 : vector<8x128xf32>, vector<8x128xf32> -> vector<8x256xf32>
    %77 = arith.truncf %76 : vector<8x256xf32> to vector<8x256xbf16>
    %c0_25 = arith.constant 0 : index
    %c256 = arith.constant 256 : index
    %78 = vector.load %arg3[%c0_25, %c256] : memref<256x384xbf16, #tpu.memory_space<vmem>>, vector<256x128xbf16>
    %cst_26 = arith.constant dense<0.000000e+00> : vector<8x128xf32>
    %79 = tpu.matmul %77, %78, %cst_26 {dimension_numbers = #tpu.dot_dimension_numbers<[1], [0], [0], [1], [0, 0, 1, 1], [], []>} : vector<8x256xbf16>, vector<256x128xbf16>, vector<8x128xf32> -> vector<8x128xf32>
    %80 = vector.extract_strided_slice %0 {offsets = [7, 0], sizes = [1, 128], strides = [1, 1]} : vector<8x256xf32> to vector<1x128xf32>
    %81 = vector.broadcast %80 : vector<1x128xf32> to vector<8x128xf32>
    %82 = arith.addf %79, %81 : vector<8x128xf32>
    %c0_27 = arith.constant 0 : index
    %c0_28 = arith.constant 0 : index
    %83 = vector.load %arg5[%c0_27, %c0_28] : memref<8x128xf32, #tpu.memory_space<vmem>>, vector<8x128xf32>
    tpu.vector_store %arg5[%c0_27, %c0_28], %82 {strides = array<i32>} : memref<8x128xf32, #tpu.memory_space<vmem>>, vector<8x128xf32>,
    return
  }
}

</mosaic_0001>

<bundles_post_ra>
// kernel: tpu_custom_call.1
= control target key start
LH: loop header
LB: loop body
LE: loop exit
PB: predicated region body
PF: predicated region fallthrough
CT: control target
= control target key end

     0   :  { %10 = vsyncpa [#allocation3], 0  ;;  %s2325_s0 = inlined_call_operand.hbm [shape: f32[8,1024], index: 0, kind: input, shape index: {}]   ;;  %s2326_s1 = inlined_call_operand.vmem [shape: f32[8,2], index: 1, kind: input, shape index: {}]   ;;  %s2327_s2 = inlined_call_operand.hbm [shape: bf16[1024,256], index: 2, kind: input, shape index: {}]   ;;  %s2328_s3 = inlined_call_operand.hbm [shape: bf16[256,384], index: 3, kind: input, shape index: {}]   ;;  %s2329_s4 = inlined_call_operand.vmem [shape: f32[8,256], index: 4, kind: input, shape index: {}]   ;;  %s2330_s5 = inlined_call_operand.hbm [shape: f32[8,128], index: 5, kind: output, shape index: {}]  }
   0x1   :  { %11 = vsyncpa [#allocation6], 0 }
   0x2   :  { %12 = vsyncpa [#allocation4], 0  ;;  %s2244_s18 = smov [#allocation5]  }
   0x3   :  { %s30_s19 = sshll.u32 %s2244_s18, 4  ;;  %s31_s19 = int_to_ptr.vmem [resolvable:$true] %s30_s19 }
   0x4   :  { %s2166_s20 = scalar_lea.vmem %s31_s19, 16384  ;;  %p2171_p1 = scmp.lt.s32.totalorder %s31_s19, %s31_s19 }
   0x5   :  { %p2167_p0 = scmp.ne.s32.totalorder %s31_s19, %s2166_s20  ;;  %p2172_p2 = scmp.lt.s32.totalorder %s2166_s20, %s2166_s20 }
   0x7   :  { %p2173_p3 = por %p2172_p2, %p2171_p1 }
   0x9   :  { %p2174_p4 = pnand %p2173_p3, %p2167_p0 }
   0xb   :  { %2177 = shalt.err (!%p2174_p4)
}
   0xc   :  { %s2245_s21 = smov 128   ;;  %s2246_s22 = smov 8  }
   0xd   :  { %36 = dma.hbm_to_vmem [thread:$0]  %s2327_s2, 16384, %s31_s19, [#allocation6], %s2245_s21, %s2245_s21, %s2246_s22  }
   0xe   :  { %s2247_s25 = smov [#allocation2]   ;;  %s2248_s27 = smov [#allocation7]  }
   0xf   :  { %s19_s26 = sshll.u32 %s2247_s25, 4  ;;  %s42_s28 = sshll.u32 %s2248_s27, 4  ;;  %s20_s26 = int_to_ptr.vmem [resolvable:$true] %s19_s26  ;;  %s43_s28 = int_to_ptr.vmem [resolvable:$true] %s42_s28 }
  0x10   :  { %s2186_s29 = scalar_lea.vmem %s20_s26, 1024  ;;  %p2191_p6 = scmp.lt.s32.totalorder %s20_s26, %s20_s26 }
  0x11   :  { %p2187_p5 = scmp.ne.s32.totalorder %s20_s26, %s2186_s29  ;;  %p2192_p7 = scmp.lt.s32.totalorder %s2186_s29, %s2186_s29 }
  0x13   :  { %p2193_p8 = por %p2192_p7, %p2191_p6 }
  0x15   :  { %p2194_p9 = pnand %p2193_p8, %p2187_p5 }
  0x17   :  { %2197 = shalt.err (!%p2194_p9)
}
  0x18   :  { %22 = dma.hbm_to_vmem [thread:$0]  %s2325_s0, 1024, %s20_s26, [#allocation3]  }
  0x19   :  { %s2206_s7 = scalar_lea.vmem %s43_s28, 6144  ;;  %p2211_p11 = scmp.lt.s32.totalorder %s43_s28, %s43_s28 }
  0x1a   :  { %p2207_p10 = scmp.ne.s32.totalorder %s43_s28, %s2206_s7  ;;  %p2212_p12 = scmp.lt.s32.totalorder %s2206_s7, %s2206_s7 }
  0x1c   :  { %p2213_p13 = por %p2212_p12, %p2211_p11 }
  0x1e   :  { %p2214_p0 = pnand %p2213_p13, %p2207_p10 }
  0x20   :  { %2217 = shalt.err (!%p2214_p0)
}
  0x21   :  { %s2249_s2 = smov 192   ;;  %s2250_s8 = smov 12  }
  0x22   :  { %48 = dma.hbm_to_vmem [thread:$0]  %s2328_s3, 6144, %s43_s28, [#allocation6], %s2249_s2, %s2249_s2, %s2250_s8  }
  0x23   :  { %2238 = dma.done.wait [#allocation3], 1024  }
  0x24   :  { %2239 = vsyncadd [#allocation3], 4294966272 }
  0x25   :  { %2240 = dma.done.wait [#allocation6], 22528  }
  0x26   :  { %2241 = vsyncadd [#allocation6], 4294944768  ;;  %v1912_v0 = vld [vmem:[#allocation5 + $0x74] ss:$8 sps:$4 sm:$0xff]   ;;  %v1916_v2 = vld [vmem:[#allocation5 + $0x70] ss:$8 sps:$4 sm:$0xff]  }
  0x27   :  { %v1914_v1 = vld [vmem:[#allocation5 + $0x174] ss:$8 sps:$4 sm:$0xff]   ;;  %848 = vmatprep.subr.bf16.mxu0 %v1912_v0  ;;  %v1917_v3 = vld [vmem:[#allocation5 + $0x170] ss:$8 sps:$4 sm:$0xff]   ;;  %v1918_v4 = vld [vmem:[#allocation5 + $0x64] ss:$8 sps:$4 sm:$0xff]  }
  0x28   :  { %889 = vmatprep.subr.bf16.mxu1 %v1914_v1  ;;  %849 = vmatpush1.bf16.msra.mxu0 %v1916_v2  ;;  %v1920_v5 = vld [vmem:[#allocation5 + $0x164] ss:$8 sps:$4 sm:$0xff]   ;;  %v1922_v6 = vld [vmem:[#allocation5 + $0x60] ss:$8 sps:$4 sm:$0xff]   ;;  %v1924_v8 = vld [vmem:[#allocation5 + $0x54] ss:$8 sps:$4 sm:$0xff]  }
  0x29   :  { %890 = vmatpush1.bf16.msra.mxu1 %v1917_v3  ;;  %850 = vmatprep.subr.bf16.mxu0 %v1918_v4  ;;  %v1923_v7 = vld [vmem:[#allocation5 + $0x160] ss:$8 sps:$4 sm:$0xff]   ;;  %v1926_v9 = vld [vmem:[#allocation5 + $0x154] ss:$8 sps:$4 sm:$0xff]   ;;  %v1928_v10 = vld [vmem:[#allocation5 + $0x50] ss:$8 sps:$4 sm:$0xff]  }
  0x2a   :  { %891 = vmatprep.subr.bf16.mxu1 %v1920_v5  ;;  %v1929_v11 = vld [vmem:[#allocation5 + $0x150] ss:$8 sps:$4 sm:$0xff]   ;;  %v1930_v12 = vld [vmem:[#allocation5 + $0x44] ss:$8 sps:$4 sm:$0xff]   ;;  %v1934_v14 = vld [vmem:[#allocation5 + $0x40] ss:$8 sps:$4 sm:$0xff]  }
  0x2b   :  { %v1932_v13 = vld [vmem:[#allocation5 + $0x144] ss:$8 sps:$4 sm:$0xff]   ;;  %v1935_v15 = vld [vmem:[#allocation5 + $0x140] ss:$8 sps:$4 sm:$0xff]   ;;  %v1936_v16 = vld [vmem:[#allocation5 + $0x34] ss:$8 sps:$4 sm:$0xff]  }
  0x2c   :  { %851 = vmatpush1.bf16.msra.mxu0 %v1922_v6  ;;  %v1938_v17 = vld [vmem:[#allocation5 + $0x134] ss:$8 sps:$4 sm:$0xff]   ;;  %v1940_v18 = vld [vmem:[#allocation5 + $0x30] ss:$8 sps:$4 sm:$0xff]   ;;  %v1942_v20 = vld [vmem:[#allocation5 + $0x24] ss:$8 sps:$4 sm:$0xff]  }
  0x2d   :  { %892 = vmatpush1.bf16.msra.mxu1 %v1923_v7  ;;  %852 = vmatprep.subr.bf16.mxu0 %v1924_v8  ;;  %v1941_v19 = vld [vmem:[#allocation5 + $0x130] ss:$8 sps:$4 sm:$0xff]   ;;  %v1944_v21 = vld [vmem:[#allocation5 + $0x124] ss:$8 sps:$4 sm:$0xff]   ;;  %v1946_v22 = vld [vmem:[#allocation5 + $0x20] ss:$8 sps:$4 sm:$0xff]  }
  0x2e   :  { %893 = vmatprep.subr.bf16.mxu1 %v1926_v9  ;;  %v1947_v23 = vld [vmem:[#allocation5 + $0x120] ss:$8 sps:$4 sm:$0xff]   ;;  %v1948_v24 = vld [vmem:[#allocation5 + $0x14] ss:$8 sps:$4 sm:$0xff]   ;;  %v1952_v26 = vld [vmem:[#allocation5 + $0x10] ss:$8 sps:$4 sm:$0xff]  }
  0x2f   :  { %v1950_v25 = vld [vmem:[#allocation5 + $0x114] ss:$8 sps:$4 sm:$0xff]   ;;  %v1953_v27 = vld [vmem:[#allocation5 + $0x110] ss:$8 sps:$4 sm:$0xff]   ;;  %v1954_v28 = vld [vmem:[#allocation5 + $0x4] ss:$8 sps:$4 sm:$0xff]  }
  0x30   :  { %853 = vmatpush1.bf16.msra.mxu0 %v1928_v10  ;;  %v1956_v29 = vld [vmem:[#allocation5 + $0x104] ss:$8 sps:$4 sm:$0xff]   ;;  %v1958_v30 = vld [vmem:[#allocation5] ss:$8 sps:$4 sm:$0xff]   ;;  %v1960_v32 = vld [vmem:[#allocation5 + $0xf4] ss:$8 sps:$4 sm:$0xff]  }
  0x31   :  { %894 = vmatpush1.bf16.msra.mxu1 %v1929_v11  ;;  %854 = vmatprep.subr.bf16.mxu0 %v1930_v12  ;;  %v1959_v31 = vld [vmem:[#allocation5 + $0x100] ss:$8 sps:$4 sm:$0xff]   ;;  %v1962_v33 = vld [vmem:[#allocation5 + $0x1f4] ss:$8 sps:$4 sm:$0xff]   ;;  %v1964_v34 = vld [vmem:[#allocation5 + $0xf0] ss:$8 sps:$4 sm:$0xff]  }
  0x32   :  { %895 = vmatprep.subr.bf16.mxu1 %v1932_v13  ;;  %v1965_v35 = vld [vmem:[#allocation5 + $0x1f0] ss:$8 sps:$4 sm:$0xff]   ;;  %v1966_v36 = vld [vmem:[#allocation5 + $0xe4] ss:$8 sps:$4 sm:$0xff]   ;;  %v1970_v38 = vld [vmem:[#allocation5 + $0xe0] ss:$8 sps:$4 sm:$0xff]  }
  0x33   :  { %v1968_v37 = vld [vmem:[#allocation5 + $0x1e4] ss:$8 sps:$4 sm:$0xff]   ;;  %v1971_v39 = vld [vmem:[#allocation5 + $0x1e0] ss:$8 sps:$4 sm:$0xff]   ;;  %v1972_v40 = vld [vmem:[#allocation5 + $0xd4] ss:$8 sps:$4 sm:$0xff]  }
  0x34   :  { %855 = vmatpush1.bf16.msra.mxu0 %v1934_v14  ;;  %v1974_v41 = vld [vmem:[#allocation5 + $0x1d4] ss:$8 sps:$4 sm:$0xff]   ;;  %v1976_v42 = vld [vmem:[#allocation5 + $0xd0] ss:$8 sps:$4 sm:$0xff]   ;;  %v1978_v44 = vld [vmem:[#allocation5 + $0xc4] ss:$8 sps:$4 sm:$0xff]  }
  0x35   :  { %896 = vmatpush1.bf16.msra.mxu1 %v1935_v15  ;;  %856 = vmatprep.subr.bf16.mxu0 %v1936_v16  ;;  %v1977_v43 = vld [vmem:[#allocation5 + $0x1d0] ss:$8 sps:$4 sm:$0xff]   ;;  %v1980_v45 = vld [vmem:[#allocation5 + $0x1c4] ss:$8 sps:$4 sm:$0xff]   ;;  %v1982_v47 = vld [vmem:[#allocation5 + $0xc0] ss:$8 sps:$4 sm:$0xff]  }
  0x36   :  { %897 = vmatprep.subr.bf16.mxu1 %v1938_v17  ;;  %v65_v46 = vld [vmem:[#allocation2 + $0x8] sm:$0xff]  ;;  %v67_v50 = vld [vmem:[#allocation2 + $0x18] sm:$0xff]  ;;  %v64_v4 = vld [vmem:[#allocation2] sm:$0xff] }
  0x37   :  { %v1983_v48 = vld [vmem:[#allocation5 + $0x1c0] ss:$8 sps:$4 sm:$0xff]   ;;  %v73_v49 = vpack.c.bf16 %v65_v46, %v65_v46  ;;  %v1984_v51 = vld [vmem:[#allocation5 + $0xb4] ss:$8 sps:$4 sm:$0xff]   ;;  %v75_v52 = vpack.c.bf16 %v67_v50, %v67_v50  ;;  %v1988_v54 = vld [vmem:[#allocation5 + $0xb0] ss:$8 sps:$4 sm:$0xff]   ;;  %v72_v8 = vpack.c.bf16 %v64_v4, %v64_v4 }
  0x38   :  { %857 = vmatpush1.bf16.msra.mxu0 %v1940_v18  ;;  %v1986_v53 = vld [vmem:[#allocation5 + $0x1b4] ss:$8 sps:$4 sm:$0xff]   ;;  %v1989_v55 = vld [vmem:[#allocation5 + $0x1b0] ss:$8 sps:$4 sm:$0xff]   ;;  %v1990_v56 = vld [vmem:[#allocation5 + $0xa4] ss:$8 sps:$4 sm:$0xff]  }
  0x39   :  { %898 = vmatpush1.bf16.msra.mxu1 %v1941_v19  ;;  %858 = vmatprep.subr.bf16.mxu0 %v1942_v20  ;;  %v1992_v57 = vld [vmem:[#allocation5 + $0x1a4] ss:$8 sps:$4 sm:$0xff]   ;;  %v1994_v58 = vld [vmem:[#allocation5 + $0xa0] ss:$8 sps:$4 sm:$0xff]   ;;  %v1996_v60 = vld [vmem:[#allocation5 + $0x94] ss:$8 sps:$4 sm:$0xff]  }
  0x3a   :  { %899 = vmatprep.subr.bf16.mxu1 %v1944_v21  ;;  %880 = vmatprep.mubr.bf16.mxu0 %v73_v49  ;;  %v1995_v59 = vld [vmem:[#allocation5 + $0x1a0] ss:$8 sps:$4 sm:$0xff]   ;;  %v1998_v61 = vld [vmem:[#allocation5 + $0x194] ss:$8 sps:$4 sm:$0xff]   ;;  %v2000_v62 = vld [vmem:[#allocation5 + $0x90] ss:$8 sps:$4 sm:$0xff]  }
  0x3b   :  { %921 = vmatprep.mubr.bf16.mxu1 %v75_v52  ;;  %v2001_v63 = vld [vmem:[#allocation5 + $0x190] ss:$8 sps:$4 sm:$0xff]   ;;  %v2002_v0 = vld [vmem:[#allocation5 + $0x84] ss:$8 sps:$4 sm:$0xff]   ;;  %v2006_v2 = vld [vmem:[#allocation5 + $0x80] ss:$8 sps:$4 sm:$0xff]  }
  0x3c   :  { %859 = vmatpush1.bf16.msra.mxu0 %v1946_v22  ;;  %v2004_v1 = vld [vmem:[#allocation5 + $0x184] ss:$8 sps:$4 sm:$0xff]   ;;  %v2007_v3 = vld [vmem:[#allocation5 + $0x180] ss:$8 sps:$4 sm:$0xff]   ;;  %v66_v5 = vld [vmem:[#allocation2 + $0x10] sm:$0xff] }
  0x3d   :  { %900 = vmatpush1.bf16.msra.mxu1 %v1947_v23  ;;  %860 = vmatprep.subr.bf16.mxu0 %v1948_v24  ;;  %v2010_v6 = vld [vmem:[#allocation5 + $0x274] ss:$8 sps:$4 sm:$0xff]   ;;  %v74_v9 = vpack.c.bf16 %v66_v5, %v66_v5  ;;  %v2008_v10 = vld [vmem:[#allocation5 + $0x270] ss:$8 sps:$4 sm:$0xff]   ;;  %v2016_v12 = vld [vmem:[#allocation5 + $0x264] ss:$8 sps:$4 sm:$0xff]  }
  0x3e   :  { %901 = vmatprep.subr.bf16.mxu1 %v1950_v25  ;;  %v2013_v7 = vld [vmem:[#allocation5 + $0x374] ss:$8 sps:$4 sm:$0xff]   ;;  %v2011_v11 = vld [vmem:[#allocation5 + $0x370] ss:$8 sps:$4 sm:$0xff]   ;;  %v2019_v13 = vld [vmem:[#allocation5 + $0x364] ss:$8 sps:$4 sm:$0xff]  }
  0x3f   :  { %v2014_v14 = vld [vmem:[#allocation5 + $0x260] ss:$8 sps:$4 sm:$0xff]   ;;  %v2022_v16 = vld [vmem:[#allocation5 + $0x254] ss:$8 sps:$4 sm:$0xff]   ;;  %v2020_v18 = vld [vmem:[#allocation5 + $0x250] ss:$8 sps:$4 sm:$0xff]  }
  0x40   :  { %861 = vmatpush1.bf16.msra.mxu0 %v1952_v26  ;;  %v2017_v15 = vld [vmem:[#allocation5 + $0x360] ss:$8 sps:$4 sm:$0xff]   ;;  %v2025_v17 = vld [vmem:[#allocation5 + $0x354] ss:$8 sps:$4 sm:$0xff]   ;;  %v2023_v19 = vld [vmem:[#allocation5 + $0x350] ss:$8 sps:$4 sm:$0xff]  }
  0x41   :  { %902 = vmatpush1.bf16.msra.mxu1 %v1953_v27  ;;  %862 = vmatprep.subr.bf16.mxu0 %v1954_v28  ;;  %v2028_v20 = vld [vmem:[#allocation5 + $0x244] ss:$8 sps:$4 sm:$0xff]   ;;  %v2026_v22 = vld [vmem:[#allocation5 + $0x240] ss:$8 sps:$4 sm:$0xff]   ;;  %v2034_v24 = vld [vmem:[#allocation5 + $0x234] ss:$8 sps:$4 sm:$0xff]  }
  0x42   :  { %903 = vmatprep.subr.bf16.mxu1 %v1956_v29  ;;  %v2031_v21 = vld [vmem:[#allocation5 + $0x344] ss:$8 sps:$4 sm:$0xff]   ;;  %v2029_v23 = vld [vmem:[#allocation5 + $0x340] ss:$8 sps:$4 sm:$0xff]   ;;  %v2037_v25 = vld [vmem:[#allocation5 + $0x334] ss:$8 sps:$4 sm:$0xff]  }
  0x43   :  { %v2032_v26 = vld [vmem:[#allocation5 + $0x230] ss:$8 sps:$4 sm:$0xff]   ;;  %v2040_v28 = vld [vmem:[#allocation5 + $0x224] ss:$8 sps:$4 sm:$0xff]   ;;  %v2062_v50 = vld [vmem:[#allocation5 + $0x2e0] ss:$8 sps:$4 sm:$0xff]  }
  0x44   :  { %863 = vmatpush1.bf16.msra.mxu0 %v1958_v30  ;;  %v2035_v27 = vld [vmem:[#allocation5 + $0x330] ss:$8 sps:$4 sm:$0xff]   ;;  %v2043_v29 = vld [vmem:[#allocation5 + $0x324] ss:$8 sps:$4 sm:$0xff]   ;;  %v2038_v30 = vld [vmem:[#allocation5 + $0x220] ss:$8 sps:$4 sm:$0xff]  }
  0x45   :  { %904 = vmatpush1.bf16.msra.mxu1 %v1959_v31  ;;  %864 = vmatprep.subr.bf16.mxu0 %v1960_v32  ;;  %v2041_v31 = vld [vmem:[#allocation5 + $0x320] ss:$8 sps:$4 sm:$0xff]   ;;  %v2046_v32 = vld [vmem:[#allocation5 + $0x214] ss:$8 sps:$4 sm:$0xff]   ;;  %v2056_v46 = vld [vmem:[#allocation5 + $0x2f0] ss:$8 sps:$4 sm:$0xff]  }
  0x46   :  { %905 = vmatprep.subr.bf16.mxu1 %v1962_v33  ;;  %v2049_v33 = vld [vmem:[#allocation5 + $0x314] ss:$8 sps:$4 sm:$0xff]   ;;  %v2067_v49 = vld [vmem:[#allocation5 + $0x3e4] ss:$8 sps:$4 sm:$0xff]  }
  0x47   :  { %v2070_v52 = vld [vmem:[#allocation5 + $0x2d4] ss:$8 sps:$4 sm:$0xff]  }
  0x48   :  { %865 = vmatpush2.bf16.msra.mxu0 %v1964_v34  ;;  %v2044_v34 = vld [vmem:[#allocation5 + $0x210] ss:$8 sps:$4 sm:$0xff]   ;;  %v2094_v4 = vld [vmem:[#allocation5 + $0x294] ss:$8 sps:$4 sm:$0xff]  }
  0x49   :  { %906 = vmatpush2.bf16.msra.mxu1 %v1965_v35  ;;  %866 = vmatprep.subr.bf16.mxu0 %v1966_v36  ;;  %v2047_v35 = vld [vmem:[#allocation5 + $0x310] ss:$8 sps:$4 sm:$0xff]   ;;  %v69_v36 = vld [vmem:[#allocation2 + $0x28] sm:$0xff]  ;;  %v2097_v5 = vld [vmem:[#allocation5 + $0x394] ss:$8 sps:$4 sm:$0xff]  }
  0x4a   :  { %907 = vmatprep.subr.bf16.mxu1 %v1968_v37  ;;  %v2052_v37 = vld [vmem:[#allocation5 + $0x204] ss:$8 sps:$4 sm:$0xff]  }
  0x4c   :  { %867 = vmatpush2.bf16.msra.mxu0 %v1970_v38  ;;  %v2055_v38 = vld [vmem:[#allocation5 + $0x304] ss:$8 sps:$4 sm:$0xff]  }
  0x4d   :  { %908 = vmatpush2.bf16.msra.mxu1 %v1971_v39  ;;  %868 = vmatprep.subr.bf16.mxu0 %v1972_v40  ;;  %v77_v39 = vpack.c.bf16 %v69_v36, %v69_v36  ;;  %v71_v40 = vld [vmem:[#allocation2 + $0x38] sm:$0xff] }
  0x4e   :  { %909 = vmatprep.subr.bf16.mxu1 %v1974_v41  ;;  %v79_v41 = vpack.c.bf16 %v71_v40, %v71_v40  ;;  %v2124_v36 = vld [vmem:[#allocation7 + $0xf0] ss:$12 sps:$4 sm:$0xff]   ;;  %v2128_v40 = vld [vmem:[#allocation7 + $0xd8] ss:$12 sps:$4 sm:$0xff]  }
  0x50   :  { %869 = vmatpush2.bf16.msra.mxu0 %v1976_v42  ;;  %v2050_v42 = vld [vmem:[#allocation5 + $0x200] ss:$8 sps:$4 sm:$0xff]  }
  0x51   :  { %910 = vmatpush2.bf16.msra.mxu1 %v1977_v43  ;;  %870 = vmatprep.subr.bf16.mxu0 %v1978_v44  ;;  %v2053_v43 = vld [vmem:[#allocation5 + $0x300] ss:$8 sps:$4 sm:$0xff]   ;;  %v2058_v44 = vld [vmem:[#allocation5 + $0x2f4] ss:$8 sps:$4 sm:$0xff]  }
  0x52   :  { %911 = vmatprep.subr.bf16.mxu1 %v1980_v45  ;;  %v2061_v45 = vld [vmem:[#allocation5 + $0x3f4] ss:$8 sps:$4 sm:$0xff]  }
  0x54   :  { %871 = vmatpush2.bf16.msra.mxu0 %v1982_v47  ;;  %v2059_v47 = vld [vmem:[#allocation5 + $0x3f0] ss:$8 sps:$4 sm:$0xff]  }
  0x55   :  { %912 = vmatpush2.bf16.msra.mxu1 %v1983_v48  ;;  %872 = vmatprep.subr.bf16.mxu0 %v1984_v51  ;;  %v2064_v48 = vld [vmem:[#allocation5 + $0x2e4] ss:$8 sps:$4 sm:$0xff]   ;;  %v2065_v51 = vld [vmem:[#allocation5 + $0x3e0] ss:$8 sps:$4 sm:$0xff]  }
  0x56   :  { %913 = vmatprep.subr.bf16.mxu1 %v1986_v53  ;;  %v2073_v53 = vld [vmem:[#allocation5 + $0x3d4] ss:$8 sps:$4 sm:$0xff]  }
  0x58   :  { %873 = vmatpush2.bf16.msra.mxu0 %v1988_v54  ;;  %v2068_v54 = vld [vmem:[#allocation5 + $0x2d0] ss:$8 sps:$4 sm:$0xff]  }
  0x59   :  { %914 = vmatpush2.bf16.msra.mxu1 %v1989_v55  ;;  %874 = vmatprep.subr.bf16.mxu0 %v1990_v56  ;;  %v2071_v55 = vld [vmem:[#allocation5 + $0x3d0] ss:$8 sps:$4 sm:$0xff]   ;;  %v2076_v56 = vld [vmem:[#allocation5 + $0x2c4] ss:$8 sps:$4 sm:$0xff]  }
  0x5a   :  { %915 = vmatprep.subr.bf16.mxu1 %v1992_v57  ;;  %v2079_v57 = vld [vmem:[#allocation5 + $0x3c4] ss:$8 sps:$4 sm:$0xff]  }
  0x5c   :  { %875 = vmatpush2.bf16.msra.mxu0 %v1994_v58  ;;  %v2074_v58 = vld [vmem:[#allocation5 + $0x2c0] ss:$8 sps:$4 sm:$0xff]  }
  0x5d   :  { %916 = vmatpush2.bf16.msra.mxu1 %v1995_v59  ;;  %876 = vmatprep.subr.bf16.mxu0 %v1996_v60  ;;  %v2077_v59 = vld [vmem:[#allocation5 + $0x3c0] ss:$8 sps:$4 sm:$0xff]   ;;  %v2082_v60 = vld [vmem:[#allocation5 + $0x2b4] ss:$8 sps:$4 sm:$0xff]  }
  0x5e   :  { %917 = vmatprep.subr.bf16.mxu1 %v1998_v61  ;;  %v2085_v61 = vld [vmem:[#allocation5 + $0x3b4] ss:$8 sps:$4 sm:$0xff]  }
  0x60   :  { %877 = vmatpush2.bf16.msra.mxu0 %v2000_v62  ;;  %v2080_v62 = vld [vmem:[#allocation5 + $0x2b0] ss:$8 sps:$4 sm:$0xff]  }
  0x61   :  { %918 = vmatpush2.bf16.msra.mxu1 %v2001_v63  ;;  %878 = vmatprep.subr.bf16.mxu0 %v2002_v0  ;;  %v2083_v63 = vld [vmem:[#allocation5 + $0x3b0] ss:$8 sps:$4 sm:$0xff]   ;;  %v2088_v0 = vld [vmem:[#allocation5 + $0x2a4] ss:$8 sps:$4 sm:$0xff]  }
  0x62   :  { %919 = vmatprep.subr.bf16.mxu1 %v2004_v1  ;;  %v2091_v1 = vld [vmem:[#allocation5 + $0x3a4] ss:$8 sps:$4 sm:$0xff]  }
  0x64   :  { %879 = vmatpush2.bf16.msra.mxu0 %v2006_v2  ;;  %v2086_v2 = vld [vmem:[#allocation5 + $0x2a0] ss:$8 sps:$4 sm:$0xff]  }
  0x65   :  { %920 = vmatpush2.bf16.msra.mxu1 %v2007_v3  ;;  %930 = vmatprep.subr.bf16.mxu0 %v2010_v6  ;;  %v2089_v3 = vld [vmem:[#allocation5 + $0x3a0] ss:$8 sps:$4 sm:$0xff]   ;;  %v2092_v6 = vld [vmem:[#allocation5 + $0x290] ss:$8 sps:$4 sm:$0xff]  }
  0x66   :  { %971 = vmatprep.subr.bf16.mxu1 %v2013_v7  ;;  %v2095_v7 = vld [vmem:[#allocation5 + $0x390] ss:$8 sps:$4 sm:$0xff]  }
  0x67   :  { %881 = vmatmul.mubr.bf16.vlgmr.msra.gmra.mxu0 %v72_v8  ;;  %v2100_v8 = vld [vmem:[#allocation5 + $0x284] ss:$8 sps:$4 sm:$0xff]  }
  0x68   :  { %922 = vmatmul.mubr.bf16.vlgmr.msra.gmra.mxu1 %v74_v9  ;;  %931 = vmatpush1.bf16.msra.mxu0 %v2008_v10  ;;  %v2103_v9 = vld [vmem:[#allocation5 + $0x384] ss:$8 sps:$4 sm:$0xff]   ;;  %v2098_v10 = vld [vmem:[#allocation5 + $0x280] ss:$8 sps:$4 sm:$0xff]  }
  0x69   :  { %972 = vmatpush1.bf16.msra.mxu1 %v2011_v11  ;;  %932 = vmatprep.subr.bf16.mxu0 %v2016_v12  ;;  %v2101_v11 = vld [vmem:[#allocation5 + $0x380] ss:$8 sps:$4 sm:$0xff]  }
  0x6a   :  { %973 = vmatprep.subr.bf16.mxu1 %v2019_v13  ;;  %962 = vmatprep.mubr.bf16.mxu0 %v77_v39  ;;  %v68_v12 = vld [vmem:[#allocation2 + $0x20] sm:$0xff]  ;;  %v70_v13 = vld [vmem:[#allocation2 + $0x30] sm:$0xff] }
  0x6b   :  { %1003 = vmatprep.mubr.bf16.mxu1 %v79_v41  ;;  %v2127_v39 = vld [vmem:[#allocation7 + $0x34] ss:$12 sps:$4 sm:$0xff]   ;;  %v2129_v41 = vld [vmem:[#allocation7 + $0xdc] ss:$12 sps:$4 sm:$0xff]  }
  0x6c   :  { %933 = vmatpush1.bf16.msra.mxu0 %v2014_v14  ;;  %v76_v14 = vpack.c.bf16 %v68_v12, %v68_v12 }
  0x6d   :  { %974 = vmatpush1.bf16.msra.mxu1 %v2017_v15  ;;  %934 = vmatprep.subr.bf16.mxu0 %v2022_v16  ;;  %v78_v15 = vpack.c.bf16 %v70_v13, %v70_v13  ;;  %v2104_v16 = vld [vmem:[#allocation7 + $0x168] ss:$12 sps:$4 sm:$0xff]  }
  0x6e   :  { %975 = vmatprep.subr.bf16.mxu1 %v2025_v17  ;;  %v2105_v17 = vld [vmem:[#allocation7 + $0x16c] ss:$12 sps:$4 sm:$0xff]  }
  0x70   :  { %935 = vmatpush1.bf16.msra.mxu0 %v2020_v18  ;;  %v2106_v18 = vld [vmem:[#allocation7 + $0xa8] ss:$12 sps:$4 sm:$0xff]  }
  0x71   :  { %976 = vmatpush1.bf16.msra.mxu1 %v2023_v19  ;;  %936 = vmatprep.subr.bf16.mxu0 %v2028_v20  ;;  %v2107_v19 = vld [vmem:[#allocation7 + $0xac] ss:$12 sps:$4 sm:$0xff]   ;;  %v2108_v20 = vld [vmem:[#allocation7 + $0x150] ss:$12 sps:$4 sm:$0xff]  }
  0x72   :  { %977 = vmatprep.subr.bf16.mxu1 %v2031_v21  ;;  %v2109_v21 = vld [vmem:[#allocation7 + $0x154] ss:$12 sps:$4 sm:$0xff]  }
  0x74   :  { %937 = vmatpush1.bf16.msra.mxu0 %v2026_v22  ;;  %v2110_v22 = vld [vmem:[#allocation7 + $0x90] ss:$12 sps:$4 sm:$0xff]  }
  0x75   :  { %978 = vmatpush1.bf16.msra.mxu1 %v2029_v23  ;;  %938 = vmatprep.subr.bf16.mxu0 %v2034_v24  ;;  %v2111_v23 = vld [vmem:[#allocation7 + $0x94] ss:$12 sps:$4 sm:$0xff]   ;;  %v2112_v24 = vld [vmem:[#allocation7 + $0x138] ss:$12 sps:$4 sm:$0xff]  }
  0x76   :  { %979 = vmatprep.subr.bf16.mxu1 %v2037_v25  ;;  %v2113_v25 = vld [vmem:[#allocation7 + $0x13c] ss:$12 sps:$4 sm:$0xff]  }
  0x78   :  { %939 = vmatpush1.bf16.msra.mxu0 %v2032_v26  ;;  %v2114_v26 = vld [vmem:[#allocation7 + $0x78] ss:$12 sps:$4 sm:$0xff]  }
  0x79   :  { %980 = vmatpush1.bf16.msra.mxu1 %v2035_v27  ;;  %940 = vmatprep.subr.bf16.mxu0 %v2040_v28  ;;  %v2115_v27 = vld [vmem:[#allocation7 + $0x7c] ss:$12 sps:$4 sm:$0xff]   ;;  %v2116_v28 = vld [vmem:[#allocation7 + $0x120] ss:$12 sps:$4 sm:$0xff]  }
  0x7a   :  { %981 = vmatprep.subr.bf16.mxu1 %v2043_v29  ;;  %v2117_v29 = vld [vmem:[#allocation7 + $0x124] ss:$12 sps:$4 sm:$0xff]  }
  0x7c   :  { %941 = vmatpush1.bf16.msra.mxu0 %v2038_v30  ;;  %v2118_v30 = vld [vmem:[#allocation7 + $0x60] ss:$12 sps:$4 sm:$0xff]  }
  0x7d   :  { %982 = vmatpush1.bf16.msra.mxu1 %v2041_v31  ;;  %942 = vmatprep.subr.bf16.mxu0 %v2046_v32  ;;  %v2119_v31 = vld [vmem:[#allocation7 + $0x64] ss:$12 sps:$4 sm:$0xff]   ;;  %v2120_v32 = vld [vmem:[#allocation7 + $0x108] ss:$12 sps:$4 sm:$0xff]  }
  0x7e   :  { %983 = vmatprep.subr.bf16.mxu1 %v2049_v33  ;;  %v2121_v33 = vld [vmem:[#allocation7 + $0x10c] ss:$12 sps:$4 sm:$0xff]  }
  0x80   :  { %943 = vmatpush1.bf16.msra.mxu0 %v2044_v34  ;;  %v2122_v34 = vld [vmem:[#allocation7 + $0x48] ss:$12 sps:$4 sm:$0xff]  }
  0x81   :  { %984 = vmatpush1.bf16.msra.mxu1 %v2047_v35  ;;  %944 = vmatprep.subr.bf16.mxu0 %v2052_v37  ;;  %v2123_v35 = vld [vmem:[#allocation7 + $0x4c] ss:$12 sps:$4 sm:$0xff]   ;;  %v2125_v37 = vld [vmem:[#allocation7 + $0xf4] ss:$12 sps:$4 sm:$0xff]  }
  0x82   :  { %985 = vmatprep.subr.bf16.mxu1 %v2055_v38  ;;  %v2126_v38 = vld [vmem:[#allocation7 + $0x30] ss:$12 sps:$4 sm:$0xff]  }
  0x84   :  { %945 = vmatpush1.bf16.msra.mxu0 %v2050_v42  ;;  %v2130_v42 = vld [vmem:[#allocation7 + $0x18] ss:$12 sps:$4 sm:$0xff]  }
  0x85   :  { %986 = vmatpush1.bf16.msra.mxu1 %v2053_v43  ;;  %946 = vmatprep.subr.bf16.mxu0 %v2058_v44  ;;  %v2131_v43 = vld [vmem:[#allocation7 + $0x1c] ss:$12 sps:$4 sm:$0xff]   ;;  %v2132_v44 = vld [vmem:[#allocation7 + $0xc0] ss:$12 sps:$4 sm:$0xff]  }
  0x86   :  { %987 = vmatprep.subr.bf16.mxu1 %v2061_v45  ;;  %v2133_v45 = vld [vmem:[#allocation7 + $0xc4] ss:$12 sps:$4 sm:$0xff]  }
  0x88   :  { %947 = vmatpush2.bf16.msra.mxu0 %v2056_v46  ;;  %v2134_v46 = vld [vmem:[#allocation7] ss:$12 sps:$4 sm:$0xff]  }
  0x89   :  { %988 = vmatpush2.bf16.msra.mxu1 %v2059_v47  ;;  %948 = vmatprep.subr.bf16.mxu0 %v2064_v48  ;;  %v2135_v47 = vld [vmem:[#allocation7 + $0x4] ss:$12 sps:$4 sm:$0xff]  }
  0x8a   :  { %989 = vmatprep.subr.bf16.mxu1 %v2067_v49 }
  0x8c   :  { %949 = vmatpush2.bf16.msra.mxu0 %v2062_v50 }
  0x8d   :  { %990 = vmatpush2.bf16.msra.mxu1 %v2065_v51  ;;  %950 = vmatprep.subr.bf16.mxu0 %v2070_v52 }
  0x8e   :  { %991 = vmatprep.subr.bf16.mxu1 %v2073_v53  ;;  %v63_v53 = vld [vmem:[%s2326_s1] sm:$0xff] }
  0x90   :  { %951 = vmatpush2.bf16.msra.mxu0 %v2068_v54  ;;  %v2251_v54 = vmov 0  }
  0x91   :  { %992 = vmatpush2.bf16.msra.mxu1 %v2071_v55  ;;  %952 = vmatprep.subr.bf16.mxu0 %v2076_v56 }
  0x92   :  { %993 = vmatprep.subr.bf16.mxu1 %v2079_v57  ;;  %1910 = vset.pattern.permute.xlu0 %v2251_v54 }
  0x93   :  { %1307 = vperm.xlu0 %1910, %v63_v53  }
  0x94   :  { %953 = vmatpush2.bf16.msra.mxu0 %v2074_v58 }
  0x95   :  { %994 = vmatpush2.bf16.msra.mxu1 %v2077_v59  ;;  %954 = vmatprep.subr.bf16.mxu0 %v2082_v60  ;;  %v2252_v59 = vmov 1  }
  0x96   :  { %995 = vmatprep.subr.bf16.mxu1 %v2085_v61 }
  0x97   :  { %1911 = vset.pattern.permute.xlu0 %v2252_v59 }
  0x98   :  { %955 = vmatpush2.bf16.msra.mxu0 %v2080_v62  ;;  %1452 = vperm.xlu0 %1911, %v63_v53  }
  0x99   :  { %996 = vmatpush2.bf16.msra.mxu1 %v2083_v63  ;;  %956 = vmatprep.subr.bf16.mxu0 %v2088_v0 }
  0x9a   :  { %997 = vmatprep.subr.bf16.mxu1 %v2091_v1 }
  0x9c   :  { %957 = vmatpush2.bf16.msra.mxu0 %v2086_v2 }
  0x9d   :  { %998 = vmatpush2.bf16.msra.mxu1 %v2089_v3  ;;  %958 = vmatprep.subr.bf16.mxu0 %v2094_v4 }
  0x9e   :  { %999 = vmatprep.subr.bf16.mxu1 %v2097_v5 }
  0xa0   :  { %959 = vmatpush2.bf16.msra.mxu0 %v2092_v6 }
  0xa1   :  { %1000 = vmatpush2.bf16.msra.mxu1 %v2095_v7  ;;  %960 = vmatprep.subr.bf16.mxu0 %v2100_v8 }
  0xa2   :  { %1001 = vmatprep.subr.bf16.mxu1 %v2103_v9 }
  0xa4   :  { %961 = vmatpush2.bf16.msra.mxu0 %v2098_v10 }
  0xa5   :  { %1002 = vmatpush2.bf16.msra.mxu1 %v2101_v11  ;;  %1834 = vmatprep.subr.bf16.mxu0 %v2104_v16 }
  0xa6   :  { %1856 = vmatprep.subr.bf16.mxu1 %v2105_v17 }
  0xa7   :  { %963 = vmatmul.mubr.bf16.vlgmr.msra.gmra.mxu0 %v76_v14 }
  0xa8   :  { %1004 = vmatmul.mubr.bf16.vlgmr.msra.gmra.mxu1 %v78_v15  ;;  %1835 = vmatpush3.bf16.msra.mxu0 %v2106_v18 }
  0xa9   :  { %1857 = vmatpush3.bf16.msra.mxu1 %v2107_v19  ;;  %1836 = vmatprep.subr.bf16.mxu0 %v2108_v20 }
  0xaa   :  { %1858 = vmatprep.subr.bf16.mxu1 %v2109_v21 }
  0xac   :  { %1837 = vmatpush3.bf16.msra.mxu0 %v2110_v22 }
  0xad   :  { %1859 = vmatpush3.bf16.msra.mxu1 %v2111_v23  ;;  %1838 = vmatprep.subr.bf16.mxu0 %v2112_v24 }
  0xae   :  { %1860 = vmatprep.subr.bf16.mxu1 %v2113_v25 }
  0xb0   :  { %1839 = vmatpush3.bf16.msra.mxu0 %v2114_v26 }
  0xb1   :  { %1861 = vmatpush3.bf16.msra.mxu1 %v2115_v27  ;;  %1840 = vmatprep.subr.bf16.mxu0 %v2116_v28 }
  0xb2   :  { %1862 = vmatprep.subr.bf16.mxu1 %v2117_v29 }
  0xb4   :  { %1841 = vmatpush3.bf16.msra.mxu0 %v2118_v30 }
  0xb5   :  { %1863 = vmatpush3.bf16.msra.mxu1 %v2119_v31  ;;  %1842 = vmatprep.subr.bf16.mxu0 %v2120_v32 }
  0xb6   :  { %1864 = vmatprep.subr.bf16.mxu1 %v2121_v33 }
  0xb8   :  { %1843 = vmatpush3.bf16.msra.mxu0 %v2122_v34 }
  0xb9   :  { %1865 = vmatpush3.bf16.msra.mxu1 %v2123_v35  ;;  %1844 = vmatprep.subr.bf16.mxu0 %v2124_v36 }
  0xba   :  { %1866 = vmatprep.subr.bf16.mxu1 %v2125_v37 }
  0xbc   :  { %1845 = vmatpush3.bf16.msra.mxu0 %v2126_v38 }
  0xbd   :  { %1867 = vmatpush3.bf16.msra.mxu1 %v2127_v39  ;;  %1846 = vmatprep.subr.bf16.mxu0 %v2128_v40 }
  0xbe   :  { %1868 = vmatprep.subr.bf16.mxu1 %v2129_v41 }
  0xc0   :  { %1847 = vmatpush3.bf16.msra.mxu0 %v2130_v42  ;;  %v1051_v42 = vlaneseq }
  0xc1   :  { %1869 = vmatpush3.bf16.msra.mxu1 %v2131_v43  ;;  %1848 = vmatprep.subr.bf16.mxu0 %v2132_v44 }
  0xc2   :  { %1870 = vmatprep.subr.bf16.mxu1 %v2133_v45  ;;  %v2296_v44 = vshrl.u32 %v1051_v42, 7 }
  0xc4   :  { %1849 = vmatpush3.bf16.msra.mxu0 %v2134_v46  ;;  %v1053_v45 = vsub.s32 0, %v2296_v44  ;;  %v2302_v46 = vld [vmem:[%s2329_s4] sm:$0xff] }
  0xc5   :  { %1871 = vmatpush3.bf16.msra.mxu1 %v2135_v47  ;;  %v1063_v47 = vsub.s32 1, %v2296_v44 }
  0xc7   :  { %v1064_v53 = vrot.slane %v2302_v46, %v1063_v47 }
 0x127   :  { %v882_v48 = vpop.f32.mrf.mxu0 }
 0x128   :  { %v923_v49 = vpop.f32.mrf.mxu1 }
 0x129   :  { %v924_v50 = vadd.f32 %v923_v49, %v882_v48  ;;  %v884_v51 = vpop.f32.mrf.mxu0  ;;  %v62_v48 = vld [vmem:[%s2329_s4 + $0x8] sm:$0xff]  ;;  %v1054_v49 = vrot.slane %v2302_v46, %v1053_v45  ;;  %s2253_s4 = smov [#allocation8]  }
 0x12a   :  { %v925_v52 = vpop.f32.mrf.mxu1  ;;  %s1648_s14 = sshll.u32 %s2253_s4, 4  ;;  %s1649_s14 = int_to_ptr.vmem [resolvable:$true] %s1648_s14 }
 0x12b   :  { %v886_v55 = vpop.f32.mrf.mxu0  ;;  %v926_v62 = vadd.f32 %v925_v52, %v884_v51  ;;  %v1058_v52 = vrot.slane %v62_v48, %v1053_v45  ;;  %s2218_s15 = scalar_lea.vmem %s1649_s14, 128  ;;  %p2223_p2 = scmp.lt.s32.totalorder %s1649_s14, %s1649_s14 }
 0x12c   :  { %v927_v56 = vpop.f32.mrf.mxu1  ;;  %p2219_p1 = scmp.ne.s32.totalorder %s1649_s14, %s2218_s15  ;;  %p2224_p3 = scmp.lt.s32.totalorder %s2218_s15, %s2218_s15 }
 0x12d   :  { %v887_v57 = vpop.f32.mrf.mxu0 }
 0x12e   :  { %v928_v58 = vpop.f32.mrf.mxu1  ;;  %v1068_v57 = vrot.slane %v62_v48, %v1063_v47  ;;  %p2225_p4 = por %p2224_p3, %p2223_p2 }
 0x130   :  { %p2226_p5 = pnand %p2225_p4, %p2219_p1 }
 0x167   :  { %v964_v60 = vpop.f32.mrf.mxu0 }
 0x168   :  { %v1005_v61 = vpop.f32.mrf.mxu1  ;;  %v965_v63 = vadd.f32 %v964_v60, %v924_v50 }
 0x169   :  { %v966_v0 = vpop.f32.mrf.mxu0 }
 0x16a   :  { %v1007_v1 = vpop.f32.mrf.mxu1  ;;  %v1006_v2 = vadd.f32 %v1005_v61, %v965_v63  ;;  %v967_v3 = vadd.f32 %v966_v0, %v926_v62 }
 0x16b   :  { %v968_v4 = vpop.f32.mrf.mxu0 }
 0x16c   :  { %v1009_v5 = vpop.f32.mrf.mxu1  ;;  %v1012_v6 = vrot.slane %v1006_v2, 4  ;;  %v1008_v7 = vadd.f32 %v1007_v1, %v967_v3  ;;  %v2136_v1 = vld [vmem:[#allocation7 + $0x170] ss:$12 sps:$4 sm:$0xff]   ;;  %v2138_v3 = vld [vmem:[#allocation7 + $0x158] ss:$12 sps:$4 sm:$0xff]  }
 0x16d   :  { %v969_v8 = vpop.f32.mrf.mxu0  ;;  %1878 = vmatprep.subr.bf16.mxu0 %v2136_v1  ;;  %v2139_v4 = vld [vmem:[#allocation7 + $0x98] ss:$12 sps:$4 sm:$0xff]   ;;  %v2140_v5 = vld [vmem:[#allocation7 + $0x140] ss:$12 sps:$4 sm:$0xff]  }
 0x16e   :  { %v1010_v9 = vpop.f32.mrf.mxu1  ;;  %v1013_v10 = vadd.f32 %v1012_v6, %v1006_v2  ;;  %v1018_v11 = vrot.slane %v1008_v7, 4  ;;  %v2141_v6 = vld [vmem:[#allocation7 + $0x80] ss:$12 sps:$4 sm:$0xff]   ;;  %v2143_v8 = vld [vmem:[#allocation7 + $0x68] ss:$12 sps:$4 sm:$0xff]  }
 0x16f   :  { %v2144_v9 = vld [vmem:[#allocation7 + $0x110] ss:$12 sps:$4 sm:$0xff]  }
 0x170   :  { %v1014_v12 = vrot.slane %v1013_v10, 2  ;;  %v1019_v13 = vadd.f32 %v1018_v11, %v1008_v7  ;;  %v2146_v11 = vld [vmem:[#allocation7 + $0xf8] ss:$12 sps:$4 sm:$0xff]  }
 0x172   :  { %v1015_v14 = vadd.f32 %v1014_v12, %v1013_v10  ;;  %v1020_v15 = vrot.slane %v1019_v13, 2  ;;  %v2145_v10 = vld [vmem:[#allocation7 + $0x50] ss:$12 sps:$4 sm:$0xff]   ;;  %v2147_v12 = vld [vmem:[#allocation7 + $0x38] ss:$12 sps:$4 sm:$0xff]  }
 0x174   :  { %v1016_v16 = vrot.slane %v1015_v14, 1  ;;  %v1021_v17 = vadd.f32 %v1020_v15, %v1019_v13  ;;  %v2148_v13 = vld [vmem:[#allocation7 + $0xe0] ss:$12 sps:$4 sm:$0xff]   ;;  %v2150_v15 = vld [vmem:[#allocation7 + $0xc8] ss:$12 sps:$4 sm:$0xff]  }
 0x176   :  { %v1017_v18 = vadd.f32 %v1016_v16, %v1015_v14  ;;  %v1022_v19 = vrot.slane %v1021_v17, 1  ;;  %v2149_v14 = vld [vmem:[#allocation7 + $0x20] ss:$12 sps:$4 sm:$0xff]   ;;  %v2151_v16 = vld [vmem:[#allocation7 + $0x8] ss:$12 sps:$4 sm:$0xff]  }
 0x178   :  { %v1025_v20 = vmul.f32 0.125, %v1017_v18  ;;  %v1023_v21 = vadd.f32 %v1022_v19, %v1021_v17  ;;  %v1312_v17 = vsub.s32 5, %v2296_v44  ;;  %v1308_v18 = vpop.permute.xlu0 %1307  ;;  %v1457_v19 = vsub.s32 6, %v2296_v44 }
 0x17a   :  { %v1027_v22 = vsub.f32 %v1006_v2, %v1025_v20  ;;  %v1026_v23 = vmul.f32 0.125, %v1023_v21  ;;  %v2137_v2 = vld [vmem:[#allocation7 + $0xb0] ss:$12 sps:$4 sm:$0xff]   ;;  %v1313_v20 = vrot.slane %v2302_v46, %v1312_v17 }
 0x17c   :  { %v1029_v24 = vmul.f32 %v1027_v22, %v1027_v22  ;;  %v1028_v25 = vsub.f32 %v1008_v7, %v1026_v23  ;;  %v2142_v7 = vld [vmem:[#allocation7 + $0x128] ss:$12 sps:$4 sm:$0xff]   ;;  %v1453_v21 = vpop.permute.xlu0 %1452 }
 0x17e   :  { %v1031_v26 = vrot.slane %v1029_v24, 4  ;;  %v1030_v27 = vmul.f32 %v1028_v25, %v1028_v25 }
 0x180   :  { %v1032_v28 = vadd.f32 %v1031_v26, %v1029_v24  ;;  %v1037_v29 = vrot.slane %v1030_v27, 4  ;;  %v1463_v26 = vsub.s32 4, %v2296_v44 }
 0x182   :  { %v1033_v30 = vrot.slane %v1032_v28, 2  ;;  %v1038_v31 = vadd.f32 %v1037_v29, %v1030_v27 }
 0x184   :  { %v1034_v32 = vadd.f32 %v1033_v30, %v1032_v28  ;;  %v1039_v33 = vrot.slane %v1038_v31, 2 }
 0x186   :  { %v1035_v34 = vrot.slane %v1034_v32, 1  ;;  %v1040_v35 = vadd.f32 %v1039_v33, %v1038_v31 }
 0x188   :  { %v1036_v36 = vadd.f32 %v1035_v34, %v1034_v32  ;;  %v1041_v37 = vrot.slane %v1040_v35, 1 }
 0x18a   :  { %v1043_v38 = vmul.f32 0.125, %v1036_v36  ;;  %v1042_v39 = vadd.f32 %v1041_v37, %v1040_v35  ;;  %v1464_v36 = vrot.slane %v2302_v46, %v1463_v26 }
 0x18c   :  { %v1045_v40 = vadd.f32 1e-05, %v1043_v38  ;;  %v1044_v41 = vmul.f32 0.125, %v1042_v39 }
 0x18e   :  { %2152 = vrsqrt.f32 %v1045_v40  ;;  %v1046_v43 = vadd.f32 1e-05, %v1044_v41 }
 0x190   :  { %2154 = vrsqrt.f32 %v1046_v43 }
 0x19b   :  { %v2153_v50 = vpop.eup %2152 }
 0x19c   :  { %v1049_v51 = vmul.f32 %v2153_v50, %v1027_v22  ;;  %v1458_v22 = vrot.slane %v2302_v46, %v1457_v19 }
 0x19d   :  { %v2155_v54 = vpop.eup %2154 }
 0x19e   :  { %v1059_v55 = vmul.f32 %v1054_v49, %v1049_v51  ;;  %v1050_v56 = vmul.f32 %v2155_v54, %v1028_v25  ;;  %v1314_v25 = vmul.f32 %v1313_v20, %v1308_v18  ;;  %v1459_v31 = vmul.f32 %v1458_v22, %v1453_v21 }
 0x1a0   :  { %v1060_v58 = vmul.f32 %v1058_v52, %v1050_v56  ;;  %v1069_v59 = vadd.f32 %v1064_v53, %v1059_v55 }
 0x1a2   :  { %v1070_v60 = vadd.f32 %v1068_v57, %v1060_v58  ;;  %v1071_v61 = vmax.f32 %v1069_v59, 0.0 }
 0x1a4   :  { %v1072_v62 = vmax.f32 %v1070_v60, 0.0  ;;  %v1073_v0 = vpack.c.bf16 %v1071_v61, %v1071_v61  ;;  %v1264_v61 = vsub.s32 2, %v2296_v44 }
 0x1a6   :  { %v1074_v63 = vpack.c.bf16 %v1072_v62, %v1072_v62  ;;  %v1269_v62 = vsub.s32 3, %v2296_v44 }
 0x1a8   :  { %1235 = vmatprep.mubr.bf16.mxu0 %v1074_v63  ;;  %1443 = vmatprep.mubr.bf16.mxu1 %v1074_v63  ;;  %v1265_v63 = vrot.slane %v2302_v46, %v1264_v61 }
 0x1a9   :  { %1236 = vmatmul.mubr.bf16.vlgmr.msra.gmra.mxu0 %v1073_v0  ;;  %1444 = vmatmul.mubr.bf16.vlgmr.msra.gmra.mxu1 %v1073_v0 }
 0x1aa   :  { %1879 = vmatpush3.bf16.msra.mxu0 %v2137_v2  ;;  %v1270_v2 = vrot.slane %v2302_v46, %v1269_v62 }
 0x1ab   :  { %1880 = vmatprep.subr.bf16.mxu0 %v2138_v3 }
 0x1ae   :  { %1881 = vmatpush3.bf16.msra.mxu0 %v2139_v4 }
 0x1af   :  { %1882 = vmatprep.subr.bf16.mxu0 %v2140_v5 }
 0x1b2   :  { %1883 = vmatpush3.bf16.msra.mxu0 %v2141_v6 }
 0x1b3   :  { %1884 = vmatprep.subr.bf16.mxu0 %v2142_v7  ;;  %v1503_v7 = vsub.s32 7, %v2296_v44 }
 0x1b6   :  { %1885 = vmatpush3.bf16.msra.mxu0 %v2143_v8 }
 0x1b7   :  { %1886 = vmatprep.subr.bf16.mxu0 %v2144_v9  ;;  %v1504_v9 = vrot.slane %v2302_v46, %v1503_v7 }
 0x1ba   :  { %1887 = vmatpush3.bf16.msra.mxu0 %v2145_v10 }
 0x1bb   :  { %1888 = vmatprep.subr.bf16.mxu0 %v2146_v11 }
 0x1be   :  { %1889 = vmatpush3.bf16.msra.mxu0 %v2147_v12 }
 0x1bf   :  { %1890 = vmatprep.subr.bf16.mxu0 %v2148_v13 }
 0x1c2   :  { %1891 = vmatpush3.bf16.msra.mxu0 %v2149_v14 }
 0x1c3   :  { %1892 = vmatprep.subr.bf16.mxu0 %v2150_v15 }
 0x1c6   :  { %1893 = vmatpush3.bf16.msra.mxu0 %v2151_v16 }
 0x269   :  { %v1850_v23 = vpop.f32.mrf.mxu0  ;;  %v1872_v24 = vpop.f32.mrf.mxu1 }
 0x26b   :  { %v1851_v27 = vpop.f32.mrf.mxu0  ;;  %v1873_v28 = vpop.f32.mrf.mxu1 }
 0x26c   :  { %v1852_v29 = vadd.f32 %v1851_v27, %v1850_v23  ;;  %v1874_v30 = vadd.f32 %v1873_v28, %v1872_v24 }
 0x26d   :  { %v1853_v32 = vpop.f32.mrf.mxu0  ;;  %v1875_v33 = vpop.f32.mrf.mxu1 }
 0x26e   :  { %v1243_v34 = vrot.slane %v1852_v29, 4  ;;  %v1446_v35 = vadd.f32 %v1874_v30, %v1314_v25 }
 0x26f   :  { %v1854_v37 = vpop.f32.mrf.mxu0  ;;  %v1876_v38 = vpop.f32.mrf.mxu1 }
 0x270   :  { %v1244_v39 = vadd.f32 %v1852_v29, %v1243_v34  ;;  %v1460_v40 = vadd.f32 %v1459_v31, %v1446_v35 }
 0x272   :  { %v1245_v41 = vrot.slane %v1244_v39, 2  ;;  %v1465_v42 = vadd.f32 %v1464_v36, %v1460_v40 }
 0x274   :  { %v1246_v43 = vadd.f32 %v1245_v41, %v1244_v39  ;;  %v1466_v45 = vmax.f32 %v1465_v42, 0.0 }
 0x276   :  { %v1247_v47 = vrot.slane %v1246_v43, 1  ;;  %v1468_v48 = vpack.c.bf16 %v1466_v45, %v1466_v45 }
 0x278   :  { %v1248_v49 = vadd.f32 %v1247_v47, %v1246_v43  ;;  %1633 = vmatprep.mubr.bf16.mxu0 %v1468_v48 }
 0x27a   :  { %v1249_v50 = vmul.f32 0.125, %v1248_v49 }
 0x27c   :  { %v1250_v51 = vsub.f32 %v1852_v29, %v1249_v50 }
 0x27e   :  { %v1251_v52 = vmul.f32 %v1250_v51, %v1250_v51 }
 0x280   :  { %v1252_v53 = vrot.slane %v1251_v52, 4 }
 0x282   :  { %v1253_v54 = vadd.f32 %v1252_v53, %v1251_v52 }
 0x284   :  { %v1254_v55 = vrot.slane %v1253_v54, 2 }
 0x286   :  { %v1255_v56 = vadd.f32 %v1254_v55, %v1253_v54 }
 0x288   :  { %v1256_v57 = vrot.slane %v1255_v56, 1 }
 0x28a   :  { %v1257_v58 = vadd.f32 %v1256_v57, %v1255_v56 }
 0x28c   :  { %v1258_v59 = vmul.f32 0.125, %v1257_v58 }
 0x28e   :  { %v1259_v60 = vadd.f32 1e-05, %v1258_v59 }
 0x290   :  { %2156 = vrsqrt.f32 %v1259_v60 }
 0x29d   :  { %v2157_v0 = vpop.eup %2156 }
 0x29e   :  { %v1261_v1 = vmul.f32 %v2157_v0, %v1250_v51 }
 0x2a0   :  { %v1266_v3 = vmul.f32 %v1265_v63, %v1261_v1 }
 0x2a2   :  { %v1271_v4 = vadd.f32 %v1270_v2, %v1266_v3 }
 0x2a4   :  { %v1272_v5 = vmax.f32 %v1271_v4, 0.0 }
 0x2a6   :  { %v1467_v6 = vpack.c.bf16 %v1272_v5, %v1272_v5 }
 0x2a8   :  { %1634 = vmatmul.mubr.bf16.vlgmr.msra.gmra.mxu0 %v1467_v6 }
 0x368   :  { %v1894_v8 = vpop.f32.mrf.mxu0 }
 0x36a   :  { %v1895_v10 = vpop.f32.mrf.mxu0 }
 0x36b   :  { %v1896_v11 = vadd.f32 %v1895_v10, %v1894_v8 }
 0x36c   :  { %v1897_v12 = vpop.f32.mrf.mxu0 }
 0x36d   :  { %v1636_v13 = vadd.f32 %v1896_v11, %v1504_v9 }
 0x36e   :  { %v1898_v14 = vpop.f32.mrf.mxu0 }
 0x36f   :  { %1641 = vst [vmem:[#allocation8] sm:$0xff] %v1636_v13 }
 0x370   :  { %2229 = shalt.err (!%p2226_p5)
}
 0x371   :  { %1651 = dma.vmem_to_hbm [thread:$0]  %s1649_s14, 128, %s2330_s5, [#allocation4]  }
 0x372   :  { %2242 = dma.done.wait [#allocation4], 128  }
 0x373   :  { %2243 = vsyncadd [#allocation4], 4294967168 }
 0x374   :  { %1655 = vsyncpa [#allocation3], 1 }
 0x375   :  { %1656 = vsyncpa [#allocation6], 1 }
 0x376   :  { %1657 = vsyncpa [#allocation4], 1 }

</bundles_post_ra>
